<compile_context>
chip_gen: v5e
topology: v5e:2x2
jax: 0.10.0
libtpu: 0.0.40
codegen_flags: <defaults>
</compile_context>

<pallas_src>
import jax
import jax.numpy as jnp
from jax.experimental import pallas as pl
from jax.experimental.pallas import tpu as pltpu

INPUT_SIZE = 2
HIDDEN_SIZE1 = 10
HIDDEN_SIZE2 = 10
OUTPUT_SIZE = 3
N = 50            # batch size used in the original script

LANES = 128       # hidden-layer width padded to one full vreg lane dim
IN_PAD = 8        # HBM-facing input feature width (2 real + 6 zero lanes)
OUT_PAD = 8       # HBM-facing output width (3 real + 5 zero lanes)
MAX_TILE_N = 2048 # row tile for large batches

_PREC = jax.lax.Precision.HIGHEST


def _round_up(a, b):
    return ((a + b - 1) // b) * b


def _mlp_kernel(x_ref, w1_ref, w2_ref, w3_ref, b1_ref, b2_ref, b3_ref, o_ref):
    """x_ref: (tile_n, 8); w1: (8,128); w2: (128,128); w3: (128,8);
    b1,b2: (1,128); b3: (1,8); o_ref: (tile_n, 8)."""
    x = x_ref[...]
    # Layer 1: (tile_n,8) x (8,128) + bias, tanh.  Padded x lanes / W1 rows are
    # zero, padded bias lanes are zero -> padded hidden lanes are exactly 0.
    h = jnp.tanh(
        jnp.dot(x, w1_ref[...], precision=_PREC,
                preferred_element_type=jnp.float32) + b1_ref[...])
    # Layer 2: (tile_n,128) x (128,128) + bias, tanh.
    h = jnp.tanh(
        jnp.dot(h, w2_ref[...], precision=_PREC,
                preferred_element_type=jnp.float32) + b2_ref[...])
    # Layer 3: narrow (tile_n,128) x (128,8) + bias; narrow 8-lane store.
    o_ref[...] = (
        jnp.dot(h, w3_ref[...], precision=_PREC,
                preferred_element_type=jnp.float32) + b3_ref[...])


@jax.jit
def mein_netz_forward(x, params):
    """x: (N, INPUT_SIZE) float32. params: padded (w1,w2,w3,b1,b2,b3).
    Returns (N, OUTPUT_SIZE) float32."""
    w1, w2, w3, b1, b2, b3 = params
    n = x.shape[0]

    # Row tile: split small/medium batches into >=2 tiles (v7x megacore);
    # cap at MAX_TILE_N for large batches.
    if n <= MAX_TILE_N:
        tile_n = max(8, _round_up(pl.cdiv(n, 2), 8))
    else:
        tile_n = MAX_TILE_N
    n_pad = _round_up(n, tile_n)

    # Narrow (n_pad, 8) input staging: only ~32 B/row, padded lanes/rows zero.
    x_pad = jnp.zeros((n_pad, IN_PAD), jnp.float32)
    x_pad = x_pad.at[:n, :INPUT_SIZE].set(x.astype(jnp.float32))

    grid = (n_pad // tile_n,)

    flops = 2 * n_pad * (IN_PAD * LANES + LANES * LANES + LANES * OUT_PAD)
    transcendentals = 2 * n_pad * LANES
    bytes_accessed = 4 * (n_pad * (IN_PAD + OUT_PAD)
                          + IN_PAD * LANES + LANES * LANES + LANES * OUT_PAD
                          + 2 * LANES + OUT_PAD)

    out = pl.pallas_call(
        _mlp_kernel,
        out_shape=jax.ShapeDtypeStruct((n_pad, OUT_PAD), jnp.float32),
        grid_spec=pltpu.PrefetchScalarGridSpec(
            num_scalar_prefetch=0,
            grid=grid,
            in_specs=[
                # Batch tile of narrow activations.
                pl.BlockSpec((tile_n, IN_PAD), lambda i: (i, 0)),
                # Weights / biases: whole arrays, VMEM-resident across tiles.
                pl.BlockSpec((IN_PAD, LANES), lambda i: (0, 0)),
                pl.BlockSpec((LANES, LANES), lambda i: (0, 0)),
                pl.BlockSpec((LANES, OUT_PAD), lambda i: (0, 0)),
                pl.BlockSpec((1, LANES), lambda i: (0, 0)),
                pl.BlockSpec((1, LANES), lambda i: (0, 0)),
                pl.BlockSpec((1, OUT_PAD), lambda i: (0, 0)),
            ],
            out_specs=pl.BlockSpec((tile_n, OUT_PAD), lambda i: (i, 0)),
        ),
        compiler_params=pltpu.CompilerParams(
            dimension_semantics=("parallel",),
            vmem_limit_bytes=32 * 1024 * 1024,
        ),
        cost_estimate=pl.CostEstimate(
            flops=flops,
            transcendentals=transcendentals,
            bytes_accessed=bytes_accessed,
        ),
    )(x_pad, w1, w2, w3, b1, b2, b3)

    # Slice the narrow slab back to the logical (N, OUTPUT_SIZE) result.
    return out[:n, :OUTPUT_SIZE]


def init_params(key):
    """Deterministic init mimicking PyTorch nn.Linear (uniform +-1/sqrt(fan_in)).

    Returns:
      params: padded (w1 (8,128), w2 (128,128), w3 (128,8),
                      b1 (1,128), b2 (1,128), b3 (1,8)), all zero-padded.
      ws, bs: unpadded per-layer weights/biases for the pure-JAX reference.
    """
    dims = [(INPUT_SIZE, HIDDEN_SIZE1),
            (HIDDEN_SIZE1, HIDDEN_SIZE2),
            (HIDDEN_SIZE2, OUTPUT_SIZE)]
    pad_shapes = [(IN_PAD, LANES), (LANES, LANES), (LANES, OUT_PAD)]
    bias_widths = [LANES, LANES, OUT_PAD]

    ws, bs, w_pads, b_pads = [], [], [], []
    for (fan_in, fan_out), wshape, bwidth in zip(dims, pad_shapes, bias_widths):
        key, kw, kb = jax.random.split(key, 3)
        bound = 1.0 / jnp.sqrt(float(fan_in))
        w = jax.random.uniform(kw, (fan_in, fan_out), jnp.float32,
                               minval=-bound, maxval=bound)
        b = jax.random.uniform(kb, (fan_out,), jnp.float32,
                               minval=-bound, maxval=bound)
        ws.append(w)
        bs.append(b)
        w_pads.append(jnp.zeros(wshape, jnp.float32).at[:fan_in, :fan_out].set(w))
        b_pads.append(jnp.zeros((1, bwidth), jnp.float32).at[0, :fan_out].set(b))

    params = (w_pads[0], w_pads[1], w_pads[2], b_pads[0], b_pads[1], b_pads[2])
    return params, ws, bs


def reference_forward(x, ws, bs):
    h1 = jnp.tanh(jnp.dot(x, ws[0], precision=_PREC) + bs[0])
    h2 = jnp.tanh(jnp.dot(h1, ws[1], precision=_PREC) + bs[1])
    return jnp.dot(h2, ws[2], precision=_PREC) + bs[2]


# TODO(synk): training loops / Lip_reg / l2_reg / LMT_reg / SDP calls are host-side
# training utilities, not part of the forward pass, and are not translated.

if __name__ == "__main__":
    key = jax.random.PRNGKey(0)
    key, kx = jax.random.split(key)
    # input = torch.Tensor(concat(rand(N,1), rand(N,1))) -> (N, 2) in [0, 1)
    x = jax.random.uniform(kx, (N, INPUT_SIZE), jnp.float32)

    params, ws, bs = init_params(key)

    out = mein_netz_forward(x, params)
    out = jax.block_until_ready(out)

    ref = reference_forward(x, ws, bs)
    assert out.shape == (N, OUTPUT_SIZE)
    assert jnp.allclose(out, ref, atol=1e-5, rtol=1e-5), (
        float(jnp.max(jnp.abs(out - ref)))
    )

    print("KERNEL_OK")
</pallas_src>

<mosaic_0001>
module attributes {stable_mosaic.version = 11 : i64} {
  func.func @_mlp_kernel(%arg0: i32, %arg1: memref<32x8xf32, #tpu.memory_space<vmem>>, %arg2: memref<8x128xf32, #tpu.memory_space<vmem>>, %arg3: memref<128x128xf32, #tpu.memory_space<vmem>>, %arg4: memref<128x8xf32, #tpu.memory_space<vmem>>, %arg5: memref<1x128xf32, #tpu.memory_space<vmem>>, %arg6: memref<1x128xf32, #tpu.memory_space<vmem>>, %arg7: memref<1x8xf32, #tpu.memory_space<vmem>>, %arg8: memref<32x8xf32, #tpu.memory_space<vmem>>) attributes {dimension_semantics = [#tpu.dimension_semantics<parallel>], iteration_bounds = array<i64: 2>, scalar_prefetch = 0 : i64, scratch_operands = 0 : i64, tpu.core_type = #tpu.core_type<tc>, window_params = [{transform_indices = @transform_0, window_bounds = array<i64: 32, 8>}, {pipeline_mode = #tpu.pipeline_mode<synchronous>, transform_indices = @transform_1, window_bounds = array<i64: 8, 128>}, {pipeline_mode = #tpu.pipeline_mode<synchronous>, transform_indices = @transform_2, window_bounds = array<i64: 128, 128>}, {pipeline_mode = #tpu.pipeline_mode<synchronous>, transform_indices = @transform_3, window_bounds = array<i64: 128, 8>}, {pipeline_mode = #tpu.pipeline_mode<synchronous>, transform_indices = @transform_4, window_bounds = array<i64: 1, 128>}, {pipeline_mode = #tpu.pipeline_mode<synchronous>, transform_indices = @transform_5, window_bounds = array<i64: 1, 128>}, {pipeline_mode = #tpu.pipeline_mode<synchronous>, transform_indices = @transform_6, window_bounds = array<i64: 1, 8>}, {transform_indices = @transform_7, window_bounds = array<i64: 32, 8>}]} {
    %c0 = arith.constant 0 : index
    %c0_0 = arith.constant 0 : index
    %0 = vector.load %arg1[%c0, %c0_0] : memref<32x8xf32, #tpu.memory_space<vmem>>, vector<32x8xf32>
    %c0_1 = arith.constant 0 : index
    %c0_2 = arith.constant 0 : index
    %1 = vector.load %arg2[%c0_1, %c0_2] : memref<8x128xf32, #tpu.memory_space<vmem>>, vector<8x128xf32>
    %cst = arith.constant dense<0.000000e+00> : vector<32x128xf32>
    %2 = tpu.matmul %0, %1, %cst {dimension_numbers = #tpu.dot_dimension_numbers<[1], [0], [0], [1], [0, 0, 1, 1], [], []>, precision = #tpu.contract_precision<fp32>} : vector<32x8xf32>, vector<8x128xf32>, vector<32x128xf32> -> vector<32x128xf32>
    %c0_3 = arith.constant 0 : index
    %c0_4 = arith.constant 0 : index
    %3 = vector.load %arg5[%c0_3, %c0_4] : memref<1x128xf32, #tpu.memory_space<vmem>>, vector<1x128xf32>
    %4 = vector.broadcast %3 : vector<1x128xf32> to vector<32x128xf32>
    %5 = arith.addf %2, %4 : vector<32x128xf32>
    %6 = math.tanh %5 : vector<32x128xf32>
    %c0_5 = arith.constant 0 : index
    %c0_6 = arith.constant 0 : index
    %7 = vector.load %arg3[%c0_5, %c0_6] : memref<128x128xf32, #tpu.memory_space<vmem>>, vector<128x128xf32>
    %cst_7 = arith.constant dense<0.000000e+00> : vector<32x128xf32>
    %8 = tpu.matmul %6, %7, %cst_7 {dimension_numbers = #tpu.dot_dimension_numbers<[1], [0], [0], [1], [0, 0, 1, 1], [], []>, precision = #tpu.contract_precision<fp32>} : vector<32x128xf32>, vector<128x128xf32>, vector<32x128xf32> -> vector<32x128xf32>
    %c0_8 = arith.constant 0 : index
    %c0_9 = arith.constant 0 : index
    %9 = vector.load %arg6[%c0_8, %c0_9] : memref<1x128xf32, #tpu.memory_space<vmem>>, vector<1x128xf32>
    %10 = vector.broadcast %9 : vector<1x128xf32> to vector<32x128xf32>
    %11 = arith.addf %8, %10 : vector<32x128xf32>
    %12 = math.tanh %11 : vector<32x128xf32>
    %c0_10 = arith.constant 0 : index
    %c0_11 = arith.constant 0 : index
    %13 = vector.load %arg4[%c0_10, %c0_11] : memref<128x8xf32, #tpu.memory_space<vmem>>, vector<128x8xf32>
    %cst_12 = arith.constant dense<0.000000e+00> : vector<32x8xf32>
    %14 = tpu.matmul %12, %13, %cst_12 {dimension_numbers = #tpu.dot_dimension_numbers<[1], [0], [0], [1], [0, 0, 1, 1], [], []>, precision = #tpu.contract_precision<fp32>} : vector<32x128xf32>, vector<128x8xf32>, vector<32x8xf32> -> vector<32x8xf32>
    %c0_13 = arith.constant 0 : index
    %c0_14 = arith.constant 0 : index
    %15 = vector.load %arg7[%c0_13, %c0_14] : memref<1x8xf32, #tpu.memory_space<vmem>>, vector<1x8xf32>
    %16 = vector.broadcast %15 : vector<1x8xf32> to vector<32x8xf32>
    %17 = arith.addf %14, %16 : vector<32x8xf32>
    %c0_15 = arith.constant 0 : index
    %c0_16 = arith.constant 0 : index
    %18 = vector.load %arg8[%c0_15, %c0_16] : memref<32x8xf32, #tpu.memory_space<vmem>>, vector<32x8xf32>
    tpu.vector_store %arg8[%c0_15, %c0_16], %17 {strides = array<i32>} : memref<32x8xf32, #tpu.memory_space<vmem>>, vector<32x8xf32>,
    return
  }
  func.func @transform_0(%arg0: i32) -> (i32, i32) {
    %c0_i32 = arith.constant 0 : i32
    %c0_i32_0 = arith.constant 0 : i32
    return %arg0, %c0_i32 : i32, i32
  }
  func.func @transform_1(%arg0: i32) -> (i32, i32) {
    %c0_i32 = arith.constant 0 : i32
    %c0_i32_0 = arith.constant 0 : i32
    %c0_i32_1 = arith.constant 0 : i32
    return %c0_i32, %c0_i32_0 : i32, i32
  }
  func.func @transform_2(%arg0: i32) -> (i32, i32) {
    %c0_i32 = arith.constant 0 : i32
    %c0_i32_0 = arith.constant 0 : i32
    %c0_i32_1 = arith.constant 0 : i32
    return %c0_i32, %c0_i32_0 : i32, i32
  }
  func.func @transform_3(%arg0: i32) -> (i32, i32) {
    %c0_i32 = arith.constant 0 : i32
    %c0_i32_0 = arith.constant 0 : i32
    %c0_i32_1 = arith.constant 0 : i32
    return %c0_i32, %c0_i32_0 : i32, i32
  }
  func.func @transform_4(%arg0: i32) -> (i32, i32) {
    %c0_i32 = arith.constant 0 : i32
    %c0_i32_0 = arith.constant 0 : i32
    %c0_i32_1 = arith.constant 0 : i32
    return %c0_i32, %c0_i32_0 : i32, i32
  }
  func.func @transform_5(%arg0: i32) -> (i32, i32) {
    %c0_i32 = arith.constant 0 : i32
    %c0_i32_0 = arith.constant 0 : i32
    %c0_i32_1 = arith.constant 0 : i32
    return %c0_i32, %c0_i32_0 : i32, i32
  }
  func.func @transform_6(%arg0: i32) -> (i32, i32) {
    %c0_i32 = arith.constant 0 : i32
    %c0_i32_0 = arith.constant 0 : i32
    %c0_i32_1 = arith.constant 0 : i32
    return %c0_i32, %c0_i32_0 : i32, i32
  }
  func.func @transform_7(%arg0: i32) -> (i32, i32) {
    %c0_i32 = arith.constant 0 : i32
    %c0_i32_0 = arith.constant 0 : i32
    return %arg0, %c0_i32 : i32, i32
  }
}

</mosaic_0001>

<bundles_post_ra>
// kernel: mein_netz_forward.1
= control target key start
LH: loop header
LB: loop body
LE: loop exit
PB: predicated region body
PF: predicated region fallthrough
CT: control target
= control target key end

     0   :  { %s1607_s24 = smov 0   ;;  %s2245_s0 = inlined_call_operand.vmem [shape: f32[64,8], index: 0, kind: input, shape index: {}]   ;;  %s2246_s1 = inlined_call_operand.vmem [shape: f32[8,128], index: 1, kind: input, shape index: {}]   ;;  %s2247_s2 = inlined_call_operand.vmem [shape: f32[128,128], index: 2, kind: input, shape index: {}]   ;;  %s2248_s3 = inlined_call_operand.vmem [shape: f32[128,8], index: 3, kind: input, shape index: {}]   ;;  %s2249_s4 = inlined_call_operand.vmem [shape: f32[1,128], index: 4, kind: input, shape index: {}]   ;;  %s2250_s5 = inlined_call_operand.vmem [shape: f32[1,128], index: 5, kind: input, shape index: {}]   ;;  %s2251_s6 = inlined_call_operand.vmem [shape: f32[1,8], index: 6, kind: input, shape index: {}]   ;;  %s2252_s7 = inlined_call_operand.vmem [shape: f32[64,8], index: 7, kind: output, shape index: {}]  }
   0x1 LB: > { %s1519_s25 = sadd.s32 4294967295, %s1565_s24   ;;  %p1523_p0 = scmp.ge.s32.totalorder %s1565_s24, 1  ;;  %s1565_s24 = sphi %s1607_s24, %s17_s24  }
   0x2   : > { %p238_p1 = scmp.lt.s32.totalorder %s1565_s24, 3 }
   0x4   : > { %p239_p2 = pnand %p1523_p0, %p238_p1 }
   0x5   : > { %s1524_s28 = sshll.u32 (!%p239_p2), %s1519_s25, 2 }
   0x6   : > { %242 = sbr.rel (%p239_p2) target bundleno = 571 (0x23b), region = 48  ;;  %p271_p3 = scmp.lt.s32.totalorder (!%p239_p2), %s1524_s28, 7 }
   0xb   : > { %v286_v0 = vld [vmem:[%s2246_s1] sm:$0xff]  ;;  %s2254_s28 = smov (!%p271_p3, %s1524_s28), 7  ;;  %vm291_vm0 = vcmask 64512   ;;  %v562_v34 = vld [vmem:[%s2247_s2 + $0x78] sm:$0xff]  ;;  %v561_v36 = vld [vmem:[%s2247_s2 + $0x70] sm:$0xff] }
   0xc   : > { %v319_v1 = vand.u32 4294901760, %v286_v0  ;;  %s1525_s29 = sshll.u32 %s2254_s28, 3  ;;  %v1633_v35 = vand.u32 4294901760, %v562_v34  ;;  %v1641_v38 = vand.u32 4294901760, %v561_v36  ;;  %v560_v39 = vld [vmem:[%s2247_s2 + $0x68] sm:$0xff]  ;;  %v559_v43 = vld [vmem:[%s2247_s2 + $0x60] sm:$0xff] }
   0xd   : > { %s274_s9 = scalar_lea.vmem %s2245_s0, %s1525_s29  ;;  %v1653_v42 = vand.u32 4294901760, %v560_v39  ;;  %v1668_v47 = vand.u32 4294901760, %v559_v43  ;;  %v558_v48 = vld [vmem:[%s2247_s2 + $0x58] sm:$0xff]  ;;  %v557_v54 = vld [vmem:[%s2247_s2 + $0x50] sm:$0xff]  ;;  %v556_v60 = vld [vmem:[%s2247_s2 + $0x48] sm:$0xff]  ;;  %s2232_s22 = scalar_lea.vmem %s2252_s7, %s1525_s29 }
   0xe   : > { %1530 = vmatpush.msra.mxu2 %v319_v1  ;;  %v370_v2 = vsub.f32 %v286_v0, %v319_v1  ;;  %320 = vmatpush.msra.mxu0 %v319_v1  ;;  %v284_v4 = vld [vmem:[%s274_s9 + $0x10] sm:$0xff]  ;;  %v285_v6 = vld [vmem:[%s274_s9 + $0x18] sm:$0xff]  ;;  %v282_v7 = vld [vmem:[%s274_s9] sm:$0xff]  ;;  %v1639_v37 = vsub.f32 %v562_v34, %v1633_v35  ;;  %v1650_v41 = vsub.f32 %v561_v36, %v1641_v38  ;;  %v1684_v53 = vand.u32 4294901760, %v558_v48 }
   0xf   : > { %v299_v8 = vsel %vm291_vm0, %v284_v4, 0  ;;  %v302_v9 = vsel %vm291_vm0, %v285_v6, 0  ;;  %v293_v10 = vsel %vm291_vm0, %v282_v7, 0  ;;  %v283_v11 = vld [vmem:[%s274_s9 + $0x8] sm:$0xff]  ;;  %v1665_v46 = vsub.f32 %v560_v39, %v1653_v42 }
  0x10   : > { %409 = vmatpush.msrb.mxu2 %v370_v2  ;;  %v371_v3 = vand.u32 4294901760, %v370_v2  ;;  %v337_v12 = vand.u32 4294901760, %v299_v8  ;;  %v345_v14 = vand.u32 4294901760, %v302_v9  ;;  %v321_v15 = vand.u32 4294901760, %v293_v10 }
  0x11   : > { %v296_v16 = vsel %vm291_vm0, %v283_v11, 0  ;;  %v634_v40 = vand.u32 4294901760, %v1639_v37  ;;  %v640_v45 = vand.u32 4294901760, %v1650_v41  ;;  %v646_v51 = vand.u32 4294901760, %v1665_v46 }
  0x12   : > { %v372_v5 = vsub.f32 %v370_v2, %v371_v3  ;;  %491 = vmatpush.msrb.mxu0 %v371_v3  ;;  %v338_v17 = vsub.f32 %v299_v8, %v337_v12  ;;  %v346_v18 = vsub.f32 %v302_v9, %v345_v14  ;;  %v322_v19 = vsub.f32 %v293_v10, %v321_v15  ;;  %v555_v2 = vld [vmem:[%s2247_s2 + $0x40] sm:$0xff]  ;;  %v554_v8 = vld [vmem:[%s2247_s2 + $0x38] sm:$0xff] }
  0x13   : > { %v329_v20 = vand.u32 4294901760, %v296_v16  ;;  %v635_v44 = vsub.f32 %v1639_v37, %v634_v40  ;;  %v641_v50 = vsub.f32 %v1650_v41, %v640_v45  ;;  %v1680_v52 = vsub.f32 %v559_v43, %v1668_v47 }
  0x14   : > { %v373_v13 = vand.u32 4294901760, %v372_v5  ;;  %v339_v21 = vand.u32 4294901760, %v338_v17  ;;  %v323_v22 = vand.u32 4294901760, %v322_v19  ;;  %v347_v25 = vand.u32 4294901760, %v346_v18 }
  0x15   : > { %v330_v23 = vsub.f32 %v296_v16, %v329_v20  ;;  %v636_v49 = vand.u32 4294901760, %v635_v44  ;;  %v642_v55 = vand.u32 4294901760, %v641_v50  ;;  %v647_v56 = vsub.f32 %v1665_v46, %v646_v51  ;;  %v549_v44 = vld [vmem:[%s2247_s2 + $0x10] sm:$0xff] }
  0x16   : > { %1531 = vmatpush.msra.mxu3 %v373_v13  ;;  %374 = vmatpush.msra.mxu1 %v373_v13  ;;  %v340_v24 = vsub.f32 %v338_v17, %v339_v21  ;;  %v324_v26 = vsub.f32 %v322_v19, %v323_v22  ;;  %v348_v30 = vsub.f32 %v346_v18, %v347_v25  ;;  %v652_v57 = vand.u32 4294901760, %v1680_v52 }
  0x17   : > { %384 = vmatmul.f32.vlgmr.msra.gmra.mxu3 %v337_v12  ;;  %376 = vmatmul.f32.vlgmr.msra.gmra.mxu1 %v321_v15  ;;  %v331_v27 = vand.u32 4294901760, %v330_v23  ;;  %v1695_v58 = vand.u32 4294901760, %v557_v54  ;;  %v1698_v59 = vsub.f32 %v558_v48, %v1684_v53  ;;  %v648_v61 = vand.u32 4294901760, %v647_v56  ;;  %v548_v56 = vld [vmem:[%s2247_s2 + $0x8] sm:$0xff] }
  0x18   : > { %447 = vmatpush.msrb.mxu3 %v319_v1  ;;  %525 = vmatpush.msrb.mxu1 %v319_v1  ;;  %v341_v28 = vand.u32 4294901760, %v340_v24  ;;  %v325_v29 = vand.u32 4294901760, %v324_v26  ;;  %v349_v32 = vand.u32 4294901760, %v348_v30  ;;  %v653_v62 = vsub.f32 %v1680_v52, %v652_v57  ;;  %v551_v26 = vld [vmem:[%s2247_s2 + $0x20] sm:$0xff] }
  0x19   : > { %v332_v31 = vsub.f32 %v330_v23, %v331_v27  ;;  %v1709_v63 = vsub.f32 %v557_v54, %v1695_v58  ;;  %v1711_v0 = vand.u32 4294901760, %v556_v60  ;;  %v658_v1 = vand.u32 4294901760, %v1698_v59 }
  0x1a   : > { %342 = vmatmul.f32.vlgmr.msra.gmra.mxu2 %v341_v28  ;;  %326 = vmatmul.f32.vlgmr.msra.gmra.mxu0 %v325_v29  ;;  %v654_v3 = vand.u32 4294901760, %v653_v62  ;;  %v1723_v6 = vand.u32 4294901760, %v555_v2  ;;  %v1784_v30 = vand.u32 4294901760, %v551_v26  ;;  %v1815_v54 = vand.u32 4294901760, %v549_v44 }
  0x1b   : > { %v333_v33 = vand.u32 4294901760, %v332_v31  ;;  %815 = vmatpush.msra.mxu1 %v1633_v35  ;;  %568 = vmatpush.msra.mxu2 %v1633_v35  ;;  %v664_v4 = vand.u32 4294901760, %v1709_v63  ;;  %v1721_v5 = vsub.f32 %v556_v60, %v1711_v0  ;;  %v659_v7 = vsub.f32 %v1698_v59, %v658_v1 }
  0x1c   : > { %747 = vmatpush.msra.mxu0 %v1639_v37  ;;  %637 = vmatpush.msra.mxu3 %v636_v49  ;;  %v1739_v11 = vsub.f32 %v555_v2, %v1723_v6  ;;  %v1795_v36 = vsub.f32 %v551_v26, %v1784_v30  ;;  %v1828_v2 = vsub.f32 %v549_v44, %v1815_v54 }
  0x1d   : > { %817 = vmatpush.msra.mxu1 %v1641_v38  ;;  %570 = vmatpush.msra.mxu2 %v1641_v38  ;;  %v665_v9 = vsub.f32 %v1709_v63, %v664_v4  ;;  %v670_v10 = vand.u32 4294901760, %v1721_v5  ;;  %v660_v13 = vand.u32 4294901760, %v659_v7  ;;  %v547_v7 = vld [vmem:[%s2247_s2] sm:$0xff] }
  0x1e   : > { %750 = vmatpush.msra.mxu0 %v1650_v41  ;;  %643 = vmatpush.msra.mxu3 %v642_v55  ;;  %v700_v49 = vand.u32 4294901760, %v1795_v36  ;;  %v1540_v41 = vld [vmem:[%s2249_s4] ss:$0 sm:$0xff] }
  0x1f   : > { %388 = vmatmul.f32.gmra.mxu3 %v345_v14  ;;  %380 = vmatmul.f32.gmra.mxu1 %v329_v20  ;;  %v671_v16 = vsub.f32 %v1721_v5, %v670_v10 }
  0x20   : > { %819 = vmatpush.msra.mxu1 %v1653_v42  ;;  %572 = vmatpush.msra.mxu2 %v1653_v42 }
  0x21   : > { %753 = vmatpush.msra.mxu0 %v1665_v46  ;;  %649 = vmatpush.msra.mxu3 %v648_v61  ;;  %v701_v61 = vsub.f32 %v1795_v36, %v700_v49 }
  0x22   : > { %350 = vmatmul.f32.gmra.mxu2 %v349_v32  ;;  %334 = vmatmul.f32.gmra.mxu0 %v333_v33  ;;  %v550_v32 = vld [vmem:[%s2247_s2 + $0x18] sm:$0xff] }
  0x23   : > { %821 = vmatpush.msra.mxu1 %v1668_v47  ;;  %574 = vmatpush.msra.mxu2 %v1668_v47  ;;  %v1797_v39 = vand.u32 4294901760, %v550_v32 }
  0x24   : > { %756 = vmatpush.msra.mxu0 %v1680_v52  ;;  %655 = vmatpush.msra.mxu3 %v654_v3  ;;  %v1833_v3 = vand.u32 4294901760, %v548_v56 }
  0x25   : > { %823 = vmatpush.msra.mxu1 %v1684_v53  ;;  %576 = vmatpush.msra.mxu2 %v1684_v53  ;;  %v1813_v50 = vsub.f32 %v550_v32, %v1797_v39 }
  0x26   : > { %759 = vmatpush.msra.mxu0 %v1698_v59  ;;  %661 = vmatpush.msra.mxu3 %v660_v13  ;;  %v712_v13 = vand.u32 4294901760, %v1828_v2 }
  0x27   : > { %451 = vmatmul.f32.vlgmr.msrb.gmra.mxu3 %v323_v22  ;;  %527 = vmatmul.f32.vlgmr.msrb.gmra.mxu1 %v321_v15  ;;  %v706_v62 = vand.u32 4294901760, %v1813_v50 }
  0x28   : > { %825 = vmatpush.msra.mxu1 %v1695_v58  ;;  %578 = vmatpush.msra.mxu2 %v1695_v58 }
  0x29   : > { %762 = vmatpush.msra.mxu0 %v1709_v63 }
  0x2a   : > { %412 = vmatmul.f32.vlgmr.msrb.gmra.mxu2 %v322_v19  ;;  %493 = vmatmul.f32.vlgmr.msrb.gmra.mxu0 %v321_v15  ;;  %v666_v15 = vand.u32 4294901760, %v665_v9  ;;  %v707_v9 = vsub.f32 %v1813_v50, %v706_v62 }
  0x2b   : > { %827 = vmatpush.msra.mxu1 %v1711_v0  ;;  %580 = vmatpush.msra.mxu2 %v1711_v0 }
  0x2c   : > { %765 = vmatpush.msra.mxu0 %v1721_v5  ;;  %667 = vmatpush.msra.mxu3 %v666_v15  ;;  %v1847_v15 = vsub.f32 %v548_v56, %v1833_v3 }
  0x2d   : > { %829 = vmatpush.msra.mxu1 %v1723_v6  ;;  %582 = vmatpush.msra.mxu2 %v1723_v6 }
  0x2e   : > { %768 = vmatpush.msra.mxu0 %v1739_v11 }
  0x2f   : > { %457 = vmatmul.f32.gmra.mxu3 %v331_v27  ;;  %531 = vmatmul.f32.gmra.mxu1 %v329_v20 }
  0x32   : > { %417 = vmatmul.f32.gmra.mxu2 %v330_v23  ;;  %497 = vmatmul.f32.gmra.mxu0 %v329_v20  ;;  %v552_v20 = vld [vmem:[%s2247_s2 + $0x28] sm:$0xff] }
  0x33   : > { %v1767_v24 = vand.u32 4294901760, %v552_v20 }
  0x35   : > { %v1782_v29 = vsub.f32 %v552_v20, %v1767_v24  ;;  %v708_v20 = vand.u32 4294901760, %v707_v9 }
  0x37   : > { %463 = vmatmul.f32.gmra.mxu3 %v339_v21  ;;  %535 = vmatmul.f32.gmra.mxu1 %v337_v12  ;;  %v672_v21 = vand.u32 4294901760, %v671_v16  ;;  %v694_v34 = vand.u32 4294901760, %v1782_v29 }
  0x39   : > { %673 = vmatpush.msra.mxu3 %v672_v21  ;;  %v695_v48 = vsub.f32 %v1782_v29, %v694_v34  ;;  %v713_v21 = vsub.f32 %v1828_v2, %v712_v13 }
  0x3a   : > { %422 = vmatmul.f32.gmra.mxu2 %v338_v17  ;;  %501 = vmatmul.f32.gmra.mxu0 %v337_v12  ;;  %v1741_v12 = vand.u32 4294901760, %v554_v8  ;;  %v676_v17 = vand.u32 4294901760, %v1739_v11 }
  0x3b   : > { %v696_v60 = vand.u32 4294901760, %v695_v48  ;;  %v714_v32 = vand.u32 4294901760, %v713_v21 }
  0x3c   : > { %v677_v22 = vsub.f32 %v1739_v11, %v676_v17  ;;  %831 = vmatpush.msra.mxu1 %v1741_v12  ;;  %584 = vmatpush.msra.mxu2 %v1741_v12 }
  0x3e   : > { %v678_v27 = vand.u32 4294901760, %v677_v22 }
  0x3f   : > { %469 = vmatmul.f32.gmra.mxu3 %v347_v25  ;;  %539 = vmatmul.f32.gmra.mxu1 %v345_v14 }
  0x40   : > { %679 = vmatpush.msra.mxu3 %v678_v27 }
  0x42   : > { %427 = vmatmul.f32.gmra.mxu2 %v346_v18  ;;  %505 = vmatmul.f32.gmra.mxu0 %v345_v14  ;;  %v553_v14 = vld [vmem:[%s2247_s2 + $0x30] sm:$0xff]  ;;  %v1754_v18 = vsub.f32 %v554_v8, %v1741_v12  ;;  %v702_v8 = vand.u32 4294901760, %v701_v61 }
  0x43   : > { %v1758_v19 = vand.u32 4294901760, %v553_v14 }
  0x44   : > { %v682_v23 = vand.u32 4294901760, %v1754_v18  ;;  %771 = vmatpush.msra.mxu0 %v1754_v18 }
  0x45   : > { %v1772_v25 = vsub.f32 %v553_v14, %v1758_v19  ;;  %833 = vmatpush.msra.mxu1 %v1758_v19  ;;  %586 = vmatpush.msra.mxu2 %v1758_v19  ;;  %v1842_v14 = vand.u32 4294901760, %v547_v7 }
  0x46   : > { %v683_v28 = vsub.f32 %v1754_v18, %v682_v23 }
  0x47   : > { %v688_v31 = vand.u32 4294901760, %v1772_v25  ;;  %774 = vmatpush.msra.mxu0 %v1772_v25  ;;  %835 = vmatpush.msra.mxu1 %v1767_v24  ;;  %v1856_v22 = vsub.f32 %v547_v7, %v1842_v14 }
  0x48   : > { %v684_v33 = vand.u32 4294901760, %v683_v28  ;;  %588 = vmatpush.msra.mxu2 %v1767_v24  ;;  %v718_v28 = vand.u32 4294901760, %v1847_v15 }
  0x49   : > { %v689_v43 = vsub.f32 %v1772_v25, %v688_v31  ;;  %777 = vmatpush.msra.mxu0 %v1782_v29  ;;  %837 = vmatpush.msra.mxu1 %v1784_v30 }
  0x4a   : > { %590 = vmatpush.msra.mxu2 %v1784_v30  ;;  %685 = vmatpush.msra.mxu3 %v684_v33  ;;  %v724_v33 = vand.u32 4294901760, %v1856_v22 }
  0x4b   : > { %v690_v55 = vand.u32 4294901760, %v689_v43  ;;  %780 = vmatpush.msra.mxu0 %v1795_v36  ;;  %839 = vmatpush.msra.mxu1 %v1797_v39  ;;  %v719_v43 = vsub.f32 %v1847_v15, %v718_v28 }
  0x4c   : > { %592 = vmatpush.msra.mxu2 %v1797_v39  ;;  %v725_v44 = vsub.f32 %v1856_v22, %v724_v33 }
  0x4d   : > { %691 = vmatpush.msra.mxu3 %v690_v55  ;;  %783 = vmatpush.msra.mxu0 %v1813_v50  ;;  %v720_v48 = vand.u32 4294901760, %v719_v43 }
  0x4e   : > { %841 = vmatpush.msra.mxu1 %v1815_v54  ;;  %594 = vmatpush.msra.mxu2 %v1815_v54  ;;  %v726_v55 = vand.u32 4294901760, %v725_v44 }
  0x4f   : > { %697 = vmatpush.msra.mxu3 %v696_v60  ;;  %786 = vmatpush.msra.mxu0 %v1828_v2 }
  0x50   : > { %843 = vmatpush.msra.mxu1 %v1833_v3  ;;  %596 = vmatpush.msra.mxu2 %v1833_v3 }
  0x51   : > { %703 = vmatpush.msra.mxu3 %v702_v8  ;;  %789 = vmatpush.msra.mxu0 %v1847_v15 }
  0x52   : > { %845 = vmatpush.msra.mxu1 %v1842_v14  ;;  %598 = vmatpush.msra.mxu2 %v1842_v14 }
  0x53   : > { %709 = vmatpush.msra.mxu3 %v708_v20  ;;  %792 = vmatpush.msra.mxu0 %v1856_v22 }
  0x54   : > { %874 = vmatpush.msrb.mxu2 %v634_v40 }
  0x55   : > { %715 = vmatpush.msra.mxu3 %v714_v32 }
  0x56   : > { %878 = vmatpush.msrb.mxu2 %v640_v45 }
  0x57   : > { %721 = vmatpush.msra.mxu3 %v720_v48 }
  0x58   : > { %882 = vmatpush.msrb.mxu2 %v646_v51 }
  0x59   : > { %727 = vmatpush.msra.mxu3 %v726_v55 }
  0x5a   : > { %886 = vmatpush.msrb.mxu2 %v652_v57 }
  0x5b   : > { %953 = vmatpush.msrb.mxu3 %v1633_v35 }
  0x5c   : > { %890 = vmatpush.msrb.mxu2 %v658_v1 }
  0x5d   : > { %955 = vmatpush.msrb.mxu3 %v1641_v38 }
  0x5e   : > { %894 = vmatpush.msrb.mxu2 %v664_v4 }
  0x5f   : > { %957 = vmatpush.msrb.mxu3 %v1653_v42 }
  0x60   : > { %898 = vmatpush.msrb.mxu2 %v670_v10 }
  0x61   : > { %959 = vmatpush.msrb.mxu3 %v1668_v47 }
  0x62   : > { %902 = vmatpush.msrb.mxu2 %v676_v17 }
  0x63   : > { %961 = vmatpush.msrb.mxu3 %v1684_v53 }
  0x64   : > { %906 = vmatpush.msrb.mxu2 %v682_v23 }
  0x65   : > { %963 = vmatpush.msrb.mxu3 %v1695_v58 }
  0x66   : > { %910 = vmatpush.msrb.mxu2 %v688_v31 }
  0x67   : > { %965 = vmatpush.msrb.mxu3 %v1711_v0 }
  0x68   : > { %914 = vmatpush.msrb.mxu2 %v694_v34 }
  0x69   : > { %967 = vmatpush.msrb.mxu3 %v1723_v6 }
  0x6a   : > { %918 = vmatpush.msrb.mxu2 %v700_v49 }
  0x6b   : > { %969 = vmatpush.msrb.mxu3 %v1741_v12 }
  0x6c   : > { %922 = vmatpush.msrb.mxu2 %v706_v62 }
  0x6d   : > { %971 = vmatpush.msrb.mxu3 %v1758_v19 }
  0x6e   : > { %926 = vmatpush.msrb.mxu2 %v712_v13 }
  0x6f   : > { %973 = vmatpush.msrb.mxu3 %v1767_v24 }
  0x70   : > { %930 = vmatpush.msrb.mxu2 %v718_v28 }
  0x71   : > { %975 = vmatpush.msrb.mxu3 %v1784_v30 }
  0x72   : > { %934 = vmatpush.msrb.mxu2 %v724_v33 }
  0x73   : > { %977 = vmatpush.msrb.mxu3 %v1797_v39 }
  0x75   : > { %979 = vmatpush.msrb.mxu3 %v1815_v54 }
  0x77   : > { %981 = vmatpush.msrb.mxu3 %v1833_v3 }
  0x79   : > { %983 = vmatpush.msrb.mxu3 %v1842_v14 }
  0x94   : > { %v377_v27 = vpop.f32.mrf.mxu1 }
  0x97   : > { %v327_v26 = vpop.f32.mrf.mxu0 }
  0x98   : > { %v328_v38 = vadd.f32 %v1540_v41, %v327_v26 }
  0x9a   : > { %v1850_v16 = vpop.f32.mrf.mxu3  ;;  %v378_v46 = vadd.f32 %v377_v27, %v328_v38 }
  0x9c   : > { %v381_v37 = vpop.f32.mrf.mxu1 }
  0x9d   : > { %v343_v56 = vpop.f32.mrf.mxu2 }
  0x9e   : > { %v344_v6 = vadd.f32 %v1540_v41, %v343_v56 }
  0x9f   : > { %v335_v61 = vpop.f32.mrf.mxu0 }
  0xa0   : > { %v336_v52 = vadd.f32 %v1540_v41, %v335_v61  ;;  %v386_v18 = vadd.f32 %v1850_v16, %v344_v6 }
  0xa2   : > { %v1876_v60 = vpop.f32.mrf.mxu3  ;;  %v382_v63 = vadd.f32 %v381_v37, %v336_v52 }
  0xa4   : > { %v528_v45 = vpop.f32.mrf.mxu1 }
  0xa5   : > { %v351_v40 = vpop.f32.mrf.mxu2 }
  0xa6   : > { %v352_v34 = vadd.f32 %v1540_v41, %v351_v40 }
  0xa7   : > { %v494_v42 = vpop.f32.mrf.mxu0 }
  0xa8   : > { %v390_v62 = vadd.f32 %v1876_v60, %v352_v34 }
  0xaa   : > { %v452_v35 = vpop.f32.mrf.mxu3 }
  0xac   : > { %v532_v4 = vpop.f32.mrf.mxu1 }
  0xad   : > { %v413_v47 = vpop.f32.mrf.mxu2 }
  0xae   : > { %v414_v51 = vadd.f32 %v413_v47, %v378_v46  ;;  %v1018_v47 = vld [vmem:[%s2248_s3 + $0x68] sm:$0xff] }
  0xaf   : > { %v498_v59 = vpop.f32.mrf.mxu0 }
  0xb0   : > { %v453_v53 = vadd.f32 %v452_v35, %v414_v51  ;;  %v1020_v35 = vld [vmem:[%s2248_s3 + $0x78] sm:$0xff] }
  0xb1   : > { %v1930_v38 = vand.u32 4294901760, %v1020_v35 }
  0xb2   : > { %v458_v57 = vpop.f32.mrf.mxu3  ;;  %v495_v58 = vadd.f32 %v494_v42, %v453_v53  ;;  %v1019_v42 = vld [vmem:[%s2248_s3 + $0x70] sm:$0xff]  ;;  %v1950_v53 = vand.u32 4294901760, %v1018_v47 }
  0xb3   : > { %v1938_v46 = vand.u32 4294901760, %v1019_v42  ;;  %1026 = vmatpush.msrb.mxu0 %v1930_v38 }
  0xb4   : > { %v529_v0 = vadd.f32 %v528_v45, %v495_v58  ;;  %v536_v31 = vpop.f32.mrf.mxu1  ;;  %v1936_v45 = vsub.f32 %v1020_v35, %v1930_v38 }
  0xb5   : > { %v418_v1 = vpop.f32.mrf.mxu2  ;;  %v1947_v52 = vsub.f32 %v1019_v42, %v1938_v46  ;;  %1028 = vmatpush.msrb.mxu0 %v1938_v46 }
  0xb6   : > { %1543 = vtanh.f32 %v529_v0  ;;  %v419_v5 = vadd.f32 %v418_v1, %v382_v63  ;;  %v1092_v51 = vand.u32 4294901760, %v1936_v45  ;;  %v1962_v63 = vsub.f32 %v1018_v47, %v1950_v53  ;;  %v1016_v1 = vld [vmem:[%s2248_s3 + $0x58] sm:$0xff] }
  0xb7   : > { %v502_v25 = vpop.f32.mrf.mxu0  ;;  %1030 = vmatpush.msrb.mxu0 %v1950_v53 }
  0xb8   : > { %v459_v10 = vadd.f32 %v458_v57, %v419_v5  ;;  %v1017_v57 = vld [vmem:[%s2248_s3 + $0x60] sm:$0xff]  ;;  %v1093_v58 = vsub.f32 %v1936_v45, %v1092_v51  ;;  %v1104_v6 = vand.u32 4294901760, %v1962_v63 }
  0xb9   : > { %v1965_v0 = vand.u32 4294901760, %v1017_v57 }
  0xba   : > { %v499_v11 = vadd.f32 %v498_v59, %v459_v10  ;;  %v464_v12 = vpop.f32.mrf.mxu3  ;;  %v1098_v59 = vand.u32 4294901760, %v1947_v52 }
  0xbb   : > { %v1977_v10 = vsub.f32 %v1017_v57, %v1965_v0  ;;  %1032 = vmatpush.msrb.mxu0 %v1965_v0 }
  0xbc   : > { %v1544_v17 = vpop.eup %1543  ;;  %v533_v19 = vadd.f32 %v532_v4, %v499_v11  ;;  %v540_v20 = vpop.f32.mrf.mxu1  ;;  %v1094_v4 = vand.u32 4294901760, %v1093_v58  ;;  %v1099_v5 = vsub.f32 %v1947_v52, %v1098_v59  ;;  %v1981_v11 = vand.u32 4294901760, %v1016_v1 }
  0xbd   : > { %v423_v23 = vpop.f32.mrf.mxu2  ;;  %v599_v24 = vand.u32 4294901760, %v1544_v17 }
  0xbe   : > { %1545 = vtanh.f32 %v533_v19  ;;  %v424_v29 = vadd.f32 %v423_v23, %v386_v18  ;;  %1095 = vmatpush.msrb.mxu1 %v1094_v4  ;;  %v1105_v18 = vsub.f32 %v1962_v63, %v1104_v6  ;;  %v1110_v19 = vand.u32 4294901760, %v1977_v10  ;;  %1034 = vmatpush.msrb.mxu0 %v1981_v11 }
  0xbf   : > { %729 = vmatmul.f32.vlgmr.msra.gmra.mxu3 %v599_v24  ;;  %v600_v30 = vsub.f32 %v1544_v17, %v599_v24  ;;  %v506_v14 = vpop.f32.mrf.mxu0  ;;  %v1100_v17 = vand.u32 4294901760, %v1099_v5 }
  0xc0   : > { %v465_v36 = vadd.f32 %v464_v12, %v424_v29  ;;  %1273 = vmatpush.msra.mxu3 %v1930_v38  ;;  %v1015_v12 = vld [vmem:[%s2248_s3 + $0x50] sm:$0xff]  ;;  %v1106_v29 = vand.u32 4294901760, %v1105_v18 }
  0xc1   : > { %795 = vmatmul.f32.vlgmr.msra.gmra.mxu0 %v600_v30  ;;  %v601_v39 = vand.u32 4294901760, %v600_v30  ;;  %v1992_v23 = vand.u32 4294901760, %v1015_v12  ;;  %1101 = vmatpush.msrb.mxu1 %v1100_v17 }
  0xc2   : > { %v503_v49 = vadd.f32 %v502_v25, %v465_v36  ;;  %v470_v7 = vpop.f32.mrf.mxu3  ;;  %1275 = vmatpush.msra.mxu3 %v1938_v46  ;;  %v1014_v25 = vld [vmem:[%s2248_s3 + $0x48] sm:$0xff] }
  0xc3   : > { %849 = vmatmul.f32.vlgmr.msra.gmra.mxu1 %v601_v39  ;;  %v602_v50 = vsub.f32 %v600_v30, %v601_v39  ;;  %v1111_v30 = vsub.f32 %v1977_v10, %v1110_v19  ;;  %v2008_v34 = vand.u32 4294901760, %v1014_v25  ;;  %v1013_v39 = vld [vmem:[%s2248_s3 + $0x40] sm:$0xff]  ;;  %1036 = vmatpush.msrb.mxu0 %v1992_v23 }
  0xc4   : > { %v1546_v54 = vpop.eup %1545  ;;  %v537_v2 = vadd.f32 %v536_v31, %v503_v49  ;;  %1277 = vmatpush.msra.mxu3 %v1950_v53  ;;  %v2006_v31 = vsub.f32 %v1015_v12, %v1992_v23  ;;  %1107 = vmatpush.msrb.mxu1 %v1106_v29 }
  0xc5   : > { %v428_v3 = vpop.f32.mrf.mxu2  ;;  %v603_v8 = vand.u32 4294901760, %v602_v50  ;;  %v607_v9 = vand.u32 4294901760, %v1546_v54  ;;  %v1112_v49 = vand.u32 4294901760, %v1111_v30  ;;  %1038 = vmatpush.msrb.mxu0 %v2008_v34  ;;  %v1006_v30 = vld [vmem:[%s2248_s3 + $0x8] sm:$0xff] }
  0xc6   : > { %1547 = vtanh.f32 %v537_v2  ;;  %v429_v13 = vadd.f32 %v428_v3, %v390_v62  ;;  %1279 = vmatpush.msra.mxu3 %v1965_v0  ;;  %v1122_v50 = vand.u32 4294901760, %v2006_v31  ;;  %v2020_v62 = vand.u32 4294901760, %v1013_v39  ;;  %v1012_v3 = vld [vmem:[%s2248_s3 + $0x38] sm:$0xff] }
  0xc7   : > { %604 = vmatmul.f32.vlgmr.msra.gmra.mxu2 %v603_v8  ;;  %733 = vmatmul.f32.gmra.mxu3 %v607_v9  ;;  %v608_v15 = vsub.f32 %v1546_v54, %v607_v9  ;;  %v2018_v54 = vsub.f32 %v1014_v25, %v2008_v34 }
  0xc8   : > { %v471_v16 = vadd.f32 %v470_v7, %v429_v13  ;;  %1205 = vmatpush.msra.mxu2 %v1936_v45  ;;  %1281 = vmatpush.msra.mxu3 %v1981_v11  ;;  %v1123_v7 = vsub.f32 %v2006_v31, %v1122_v50  ;;  %v2038_v13 = vand.u32 4294901760, %v1012_v3 }
  0xc9   : > { %800 = vmatmul.f32.gmra.mxu0 %v608_v15  ;;  %v609_v21 = vand.u32 4294901760, %v608_v15  ;;  %1113 = vmatpush.msrb.mxu1 %v1112_v49  ;;  %v1128_v8 = vand.u32 4294901760, %v2018_v54 }
  0xca   : > { %v507_v22 = vadd.f32 %v506_v14, %v471_v16  ;;  %1208 = vmatpush.msra.mxu2 %v1947_v52  ;;  %1283 = vmatpush.msra.mxu3 %v1992_v23  ;;  %v1124_v16 = vand.u32 4294901760, %v1123_v7  ;;  %v2134_v7 = vand.u32 4294901760, %v1006_v30 }
  0xcb   : > { %855 = vmatmul.f32.gmra.mxu1 %v609_v21  ;;  %v610_v26 = vsub.f32 %v608_v15, %v609_v21  ;;  %v1011_v15 = vld [vmem:[%s2248_s3 + $0x30] sm:$0xff]  ;;  %1040 = vmatpush.msrb.mxu0 %v2020_v62 }
  0xcc   : > { %v1548_v27 = vpop.eup %1547  ;;  %v541_v28 = vadd.f32 %v540_v20, %v507_v22  ;;  %1211 = vmatpush.msra.mxu2 %v1962_v63  ;;  %1285 = vmatpush.msra.mxu3 %v2008_v34  ;;  %v1129_v20 = vsub.f32 %v2018_v54, %v1128_v8  ;;  %v2051_v22 = vsub.f32 %v1012_v3, %v2038_v13 }
  0xcd   : > { %v611_v32 = vand.u32 4294901760, %v610_v26  ;;  %v615_v33 = vand.u32 4294901760, %v1548_v27  ;;  %1042 = vmatpush.msrb.mxu0 %v2038_v13 }
  0xce   : > { %1549 = vtanh.f32 %v541_v28  ;;  %1214 = vmatpush.msra.mxu2 %v1977_v10  ;;  %1287 = vmatpush.msra.mxu3 %v2020_v62  ;;  %v1010_v28 = vld [vmem:[%s2248_s3 + $0x28] sm:$0xff] }
  0xcf   : > { %612 = vmatmul.f32.gmra.mxu2 %v611_v32  ;;  %737 = vmatmul.f32.gmra.mxu3 %v615_v33  ;;  %v616_v43 = vsub.f32 %v1548_v27, %v615_v33  ;;  %v2057_v27 = vand.u32 4294901760, %v1011_v15  ;;  %v1130_v32 = vand.u32 4294901760, %v1129_v20 }
  0xd0   : > { %1289 = vmatpush.msra.mxu3 %v2038_v13 }
  0xd1   : > { %805 = vmatmul.f32.gmra.mxu0 %v616_v43  ;;  %v617_v44 = vand.u32 4294901760, %v616_v43 }
  0xd2   : > { %1291 = vmatpush.msra.mxu3 %v2057_v27  ;;  %1044 = vmatpush.msrb.mxu0 %v2057_v27 }
  0xd3   : > { %861 = vmatmul.f32.gmra.mxu1 %v617_v44  ;;  %v618_v48 = vsub.f32 %v616_v43, %v617_v44  ;;  %v1140_v43 = vand.u32 4294901760, %v2051_v22  ;;  %v2066_v44 = vand.u32 4294901760, %v1010_v28 }
  0xd4   : > { %v1550_v55 = vpop.eup %1549 }
  0xd5   : > { %v619_v56 = vand.u32 4294901760, %v618_v48  ;;  %v623_v60 = vand.u32 4294901760, %v1550_v55  ;;  %v2071_v48 = vsub.f32 %v1011_v15, %v2057_v27  ;;  %1293 = vmatpush.msra.mxu3 %v2066_v44  ;;  %1046 = vmatpush.msrb.mxu0 %v2066_v44 }
  0xd7   : > { %620 = vmatmul.f32.gmra.mxu2 %v619_v56  ;;  %741 = vmatmul.f32.gmra.mxu3 %v623_v60  ;;  %v624_v61 = vsub.f32 %v1550_v55, %v623_v60  ;;  %v1009_v55 = vld [vmem:[%s2248_s3 + $0x20] sm:$0xff] }
  0xd9   : > { %810 = vmatmul.f32.gmra.mxu0 %v624_v61  ;;  %v625_v37 = vand.u32 4294901760, %v624_v61 }
  0xdb   : > { %867 = vmatmul.f32.gmra.mxu1 %v625_v37  ;;  %v626_v40 = vsub.f32 %v624_v61, %v625_v37  ;;  %v2081_v61 = vsub.f32 %v1010_v28, %v2066_v44  ;;  %v2083_v37 = vand.u32 4294901760, %v1009_v55 }
  0xdd   : > { %v627_v41 = vand.u32 4294901760, %v626_v40  ;;  %v1146_v40 = vand.u32 4294901760, %v2071_v48  ;;  %v1152_v42 = vand.u32 4294901760, %v2081_v61  ;;  %v2094_v47 = vsub.f32 %v1009_v55, %v2083_v37  ;;  %1295 = vmatpush.msra.mxu3 %v2083_v37  ;;  %1048 = vmatpush.msrb.mxu0 %v2083_v37 }
  0xdf   : > { %628 = vmatmul.f32.gmra.mxu2 %v627_v41  ;;  %985 = vmatmul.f32.vlgmr.msrb.gmra.mxu3 %v599_v24  ;;  %v1008_v41 = vld [vmem:[%s2248_s3 + $0x18] sm:$0xff]  ;;  %v1147_v58 = vsub.f32 %v2071_v48, %v1146_v40  ;;  %v1153_v4 = vsub.f32 %v2081_v61, %v1152_v42  ;;  %v1158_v5 = vand.u32 4294901760, %v2094_v47 }
  0xe0   : > { %v2096_v57 = vand.u32 4294901760, %v1008_v41 }
  0xe1   : > { %v1148_v29 = vand.u32 4294901760, %v1147_v58  ;;  %v1159_v49 = vsub.f32 %v2094_v47, %v1158_v5 }
  0xe2   : > { %v2112_v12 = vsub.f32 %v1008_v41, %v2096_v57  ;;  %1297 = vmatpush.msra.mxu3 %v2096_v57  ;;  %1050 = vmatpush.msrb.mxu0 %v2096_v57 }
  0xe3   : > { %v1160_v15 = vand.u32 4294901760, %v1159_v49  ;;  %v1541_v49 = vld [vmem:[%s2250_s5] ss:$0 sm:$0xff] }
  0xe7   : > { %936 = vmatmul.f32.vlgmr.msrb.gmra.mxu2 %v599_v24  ;;  %989 = vmatmul.f32.gmra.mxu3 %v607_v9  ;;  %v1995_v24 = vsub.f32 %v1016_v1, %v1981_v11  ;;  %v1007_v1 = vld [vmem:[%s2248_s3 + $0x10] sm:$0xff] }
  0xe8   : > { %v2114_v17 = vand.u32 4294901760, %v1007_v1 }
  0xe9   : > { %v1116_v36 = vand.u32 4294901760, %v1995_v24  ;;  %1217 = vmatpush.msra.mxu2 %v1995_v24 }
  0xea   : > { %v2131_v3 = vsub.f32 %v1007_v1, %v2114_v17  ;;  %1299 = vmatpush.msra.mxu3 %v2114_v17  ;;  %1052 = vmatpush.msrb.mxu0 %v2114_v17 }
  0xeb   : > { %v1117_v2 = vsub.f32 %v1995_v24, %v1116_v36  ;;  %1220 = vmatpush.msra.mxu2 %v2006_v31 }
  0xec   : > { %v1170_v28 = vand.u32 4294901760, %v2131_v3  ;;  %1301 = vmatpush.msra.mxu3 %v2134_v7  ;;  %1054 = vmatpush.msrb.mxu0 %v2134_v7 }
  0xed   : > { %v1118_v14 = vand.u32 4294901760, %v1117_v2  ;;  %1223 = vmatpush.msra.mxu2 %v2018_v54  ;;  %v1164_v2 = vand.u32 4294901760, %v2112_v12 }
  0xef   : > { %940 = vmatmul.f32.gmra.mxu2 %v607_v9  ;;  %993 = vmatmul.f32.gmra.mxu3 %v615_v33  ;;  %v2036_v9 = vsub.f32 %v1013_v39, %v2020_v62  ;;  %v1154_v39 = vand.u32 4294901760, %v1153_v4 }
  0xf0   : > { %1119 = vmatpush.msrb.mxu1 %v1118_v14  ;;  %v1005_v14 = vld [vmem:[%s2248_s3] sm:$0xff] }
  0xf1   : > { %v1134_v21 = vand.u32 4294901760, %v2036_v9  ;;  %1226 = vmatpush.msra.mxu2 %v2036_v9  ;;  %v2142_v20 = vand.u32 4294901760, %v1005_v14 }
  0xf2   : > { %1125 = vmatpush.msrb.mxu1 %v1124_v16  ;;  %v1165_v16 = vsub.f32 %v2112_v12, %v1164_v2 }
  0xf3   : > { %1229 = vmatpush.msra.mxu2 %v2051_v22  ;;  %v2152_v55 = vsub.f32 %v1005_v14, %v2142_v20  ;;  %1303 = vmatpush.msra.mxu3 %v2142_v20 }
  0xf4   : > { %1131 = vmatpush.msrb.mxu1 %v1130_v32  ;;  %v2148_v32 = vsub.f32 %v1006_v30, %v2134_v7  ;;  %1056 = vmatpush.msrb.mxu0 %v2142_v20 }
  0xf5   : > { %1232 = vmatpush.msra.mxu2 %v2071_v48  ;;  %v1182_v41 = vand.u32 4294901760, %v2152_v55 }
  0xf6   : > { %1332 = vmatpush.msra.mxu0 %v1092_v51 }
  0xf7   : > { %944 = vmatmul.f32.gmra.mxu2 %v615_v33  ;;  %997 = vmatmul.f32.gmra.mxu3 %v623_v60  ;;  %v1135_v33 = vsub.f32 %v2036_v9, %v1134_v21 }
  0xf8   : > { %1235 = vmatpush.msra.mxu2 %v2081_v61  ;;  %1336 = vmatpush.msra.mxu0 %v1098_v59 }
  0xf9   : > { %v1136_v56 = vand.u32 4294901760, %v1135_v33  ;;  %v1166_v33 = vand.u32 4294901760, %v1165_v16 }
  0xfa   : > { %1238 = vmatpush.msra.mxu2 %v2094_v47  ;;  %1340 = vmatpush.msra.mxu0 %v1104_v6 }
  0xfb   : > { %1137 = vmatpush.msrb.mxu1 %v1136_v56  ;;  %v1171_v56 = vsub.f32 %v2131_v3, %v1170_v28 }
  0xfc   : > { %1241 = vmatpush.msra.mxu2 %v2112_v12  ;;  %1344 = vmatpush.msra.mxu0 %v1110_v19 }
  0xfd   : > { %v1172_v1 = vand.u32 4294901760, %v1171_v56 }
  0xfe   : > { %1244 = vmatpush.msra.mxu2 %v2131_v3  ;;  %1348 = vmatpush.msra.mxu0 %v1116_v36 }
  0xff   : > { %948 = vmatmul.f32.gmra.mxu2 %v623_v60  ;;  %v1141_v60 = vsub.f32 %v2051_v22, %v1140_v43 }
 0x100   : > { %1247 = vmatpush.msra.mxu2 %v2148_v32  ;;  %1352 = vmatpush.msra.mxu0 %v1122_v50 }
 0x101   : > { %v1142_v35 = vand.u32 4294901760, %v1141_v60  ;;  %v1176_v60 = vand.u32 4294901760, %v2148_v32 }
 0x102   : > { %1250 = vmatpush.msra.mxu2 %v2152_v55  ;;  %1356 = vmatpush.msra.mxu0 %v1128_v8 }
 0x103   : > { %1143 = vmatpush.msrb.mxu1 %v1142_v35  ;;  %v1177_v4 = vsub.f32 %v2148_v32, %v1176_v60 }
 0x104   : > { %1360 = vmatpush.msra.mxu0 %v1134_v21 }
 0x105   : > { %1149 = vmatpush.msrb.mxu1 %v1148_v29  ;;  %v1183_v29 = vsub.f32 %v2152_v55, %v1182_v41  ;;  %v1178_v30 = vand.u32 4294901760, %v1177_v4 }
 0x106   : > { %1364 = vmatpush.msra.mxu0 %v1140_v43 }
 0x107   : > { %1155 = vmatpush.msrb.mxu1 %v1154_v39  ;;  %v1184_v39 = vand.u32 4294901760, %v1183_v29 }
 0x108   : > { %1368 = vmatpush.msra.mxu0 %v1146_v40 }
 0x109   : > { %1161 = vmatpush.msrb.mxu1 %v1160_v15 }
 0x10a   : > { %1372 = vmatpush.msra.mxu0 %v1152_v42 }
 0x10b   : > { %1167 = vmatpush.msrb.mxu1 %v1166_v33 }
 0x10c   : > { %1376 = vmatpush.msra.mxu0 %v1158_v5 }
 0x10d   : > { %1173 = vmatpush.msrb.mxu1 %v1172_v1 }
 0x10e   : > { %1380 = vmatpush.msra.mxu0 %v1164_v2 }
 0x10f   : > { %1179 = vmatpush.msrb.mxu1 %v1178_v30 }
 0x110   : > { %1384 = vmatpush.msra.mxu0 %v1170_v28 }
 0x111   : > { %1185 = vmatpush.msrb.mxu1 %v1184_v39 }
 0x112   : > { %1388 = vmatpush.msra.mxu0 %v1176_v60 }
 0x113   : > { %1411 = vmatpush.msra.mxu1 %v1930_v38 }
 0x114   : > { %1392 = vmatpush.msra.mxu0 %v1182_v41 }
 0x115   : > { %1413 = vmatpush.msra.mxu1 %v1938_v46 }
 0x117   : > { %1415 = vmatpush.msra.mxu1 %v1950_v53 }
 0x119   : > { %1417 = vmatpush.msra.mxu1 %v1965_v0 }
 0x11b   : > { %1419 = vmatpush.msra.mxu1 %v1981_v11 }
 0x11d   : > { %1421 = vmatpush.msra.mxu1 %v1992_v23 }
 0x11f   : > { %1423 = vmatpush.msra.mxu1 %v2008_v34 }
 0x121   : > { %1425 = vmatpush.msra.mxu1 %v2020_v62 }
 0x123   : > { %1427 = vmatpush.msra.mxu1 %v2038_v13 }
 0x125   : > { %1429 = vmatpush.msra.mxu1 %v2057_v27 }
 0x127   : > { %1431 = vmatpush.msra.mxu1 %v2066_v44 }
 0x129   : > { %1433 = vmatpush.msra.mxu1 %v2083_v37 }
 0x12b   : > { %1435 = vmatpush.msra.mxu1 %v2096_v57 }
 0x12d   : > { %1437 = vmatpush.msra.mxu1 %v2114_v17 }
 0x12f   : > { %1439 = vmatpush.msra.mxu1 %v2134_v7 }
 0x131   : > { %1441 = vmatpush.msra.mxu1 %v2142_v20 }
 0x13e   : > { %v796_v59 = vpop.f32.mrf.mxu0 }
 0x140   : > { %v850_v46 = vpop.f32.mrf.mxu1 }
 0x142   : > { %v2054_v26 = vpop.f32.mrf.mxu3 }
 0x146   : > { %v801_v10 = vpop.f32.mrf.mxu0 }
 0x148   : > { %v856_v31 = vpop.f32.mrf.mxu1 }
 0x14a   : > { %v605_v18 = vpop.f32.mrf.mxu2  ;;  %v2118_v25 = vpop.f32.mrf.mxu3 }
 0x14b   : > { %v606_v52 = vadd.f32 %v1541_v49, %v605_v18 }
 0x14d   : > { %v731_v38 = vadd.f32 %v2054_v26, %v606_v52 }
 0x14e   : > { %v806_v9 = vpop.f32.mrf.mxu0 }
 0x14f   : > { %v797_v6 = vadd.f32 %v796_v59, %v731_v38 }
 0x150   : > { %v862_v44 = vpop.f32.mrf.mxu1 }
 0x151   : > { %v851_v19 = vadd.f32 %v850_v46, %v797_v6  ;;  %v1542_v6 = vld [vmem:[%s2251_s6] ss:$0 sm:$0xff] }
 0x152   : > { %v613_v35 = vpop.f32.mrf.mxu2  ;;  %v738_v58 = vpop.f32.mrf.mxu3 }
 0x153   : > { %v614_v53 = vadd.f32 %v1541_v49, %v613_v35 }
 0x155   : > { %v735_v11 = vadd.f32 %v2118_v25, %v614_v53 }
 0x156   : > { %v811_v12 = vpop.f32.mrf.mxu0 }
 0x157   : > { %v802_v50 = vadd.f32 %v801_v10, %v735_v11 }
 0x158   : > { %v868_v14 = vpop.f32.mrf.mxu1 }
 0x159   : > { %v857_v8 = vadd.f32 %v856_v31, %v802_v50 }
 0x15a   : > { %v621_v45 = vpop.f32.mrf.mxu2  ;;  %v742_v51 = vpop.f32.mrf.mxu3 }
 0x15b   : > { %v622_v34 = vadd.f32 %v1541_v49, %v621_v45 }
 0x15d   : > { %v739_v62 = vadd.f32 %v738_v58, %v622_v34 }
 0x15f   : > { %v807_v43 = vadd.f32 %v806_v9, %v739_v62 }
 0x161   : > { %v863_v40 = vadd.f32 %v862_v44, %v807_v43 }
 0x162   : > { %v629_v63 = vpop.f32.mrf.mxu2  ;;  %v986_v0 = vpop.f32.mrf.mxu3 }
 0x163   : > { %v630_v26 = vadd.f32 %v1541_v49, %v629_v63 }
 0x165   : > { %v743_v37 = vadd.f32 %v742_v51, %v630_v26 }
 0x167   : > { %v812_v2 = vadd.f32 %v811_v12, %v743_v37 }
 0x169   : > { %v869_v16 = vadd.f32 %v868_v14, %v812_v2 }
 0x16a   : > { %v937_v23 = vpop.f32.mrf.mxu2  ;;  %v990_v54 = vpop.f32.mrf.mxu3 }
 0x16b   : > { %v938_v24 = vadd.f32 %v937_v23, %v851_v19 }
 0x16d   : > { %v987_v36 = vadd.f32 %v986_v0, %v938_v24 }
 0x16f   : > { %1551 = vtanh.f32 %v987_v36 }
 0x172   : > { %v941_v13 = vpop.f32.mrf.mxu2  ;;  %v994_v42 = vpop.f32.mrf.mxu3 }
 0x173   : > { %v942_v21 = vadd.f32 %v941_v13, %v857_v8 }
 0x175   : > { %v1552_v22 = vpop.eup %1551  ;;  %v991_v27 = vadd.f32 %v990_v54, %v942_v21 }
 0x176   : > { %v1057_v48 = vand.u32 4294901760, %v1552_v22 }
 0x177   : > { %1553 = vtanh.f32 %v991_v27 }
 0x178   : > { %1187 = vmatmul.f32.vlgmr.msrb.gmra.mxu1 %v1057_v48  ;;  %v1058_v61 = vsub.f32 %v1552_v22, %v1057_v48 }
 0x17a   : > { %v945_v47 = vpop.f32.mrf.mxu2  ;;  %1253 = vmatmul.f32.vlgmr.msra.gmra.mxu2 %v1058_v61  ;;  %v1059_v57 = vand.u32 4294901760, %v1058_v61  ;;  %v998_v33 = vpop.f32.mrf.mxu3 }
 0x17b   : > { %v946_v5 = vadd.f32 %v945_v47, %v863_v40 }
 0x17c   : > { %1307 = vmatmul.f32.vlgmr.msra.gmra.mxu3 %v1059_v57  ;;  %v1060_v17 = vsub.f32 %v1058_v61, %v1059_v57 }
 0x17d   : > { %v1554_v18 = vpop.eup %1553  ;;  %v995_v25 = vadd.f32 %v994_v42, %v946_v5 }
 0x17e   : > { %v1061_v3 = vand.u32 4294901760, %v1060_v17  ;;  %v1065_v7 = vand.u32 4294901760, %v1554_v18 }
 0x17f   : > { %1555 = vtanh.f32 %v995_v25 }
 0x180   : > { %1062 = vmatmul.f32.vlgmr.msrb.gmra.mxu0 %v1061_v3  ;;  %1191 = vmatmul.f32.gmra.mxu1 %v1065_v7  ;;  %v1066_v15 = vsub.f32 %v1554_v18, %v1065_v7 }
 0x182   : > { %v949_v20 = vpop.f32.mrf.mxu2  ;;  %1258 = vmatmul.f32.gmra.mxu2 %v1066_v15  ;;  %v1067_v28 = vand.u32 4294901760, %v1066_v15 }
 0x183   : > { %v950_v32 = vadd.f32 %v949_v20, %v869_v16 }
 0x184   : > { %1313 = vmatmul.f32.gmra.mxu3 %v1067_v28  ;;  %v1068_v55 = vsub.f32 %v1066_v15, %v1067_v28 }
 0x185   : > { %v1556_v56 = vpop.eup %1555  ;;  %v999_v60 = vadd.f32 %v998_v33, %v950_v32 }
 0x186   : > { %v1069_v41 = vand.u32 4294901760, %v1068_v55  ;;  %v1073_v35 = vand.u32 4294901760, %v1556_v56 }
 0x187   : > { %1557 = vtanh.f32 %v999_v60 }
 0x188   : > { %1070 = vmatmul.f32.gmra.mxu0 %v1069_v41  ;;  %1195 = vmatmul.f32.gmra.mxu1 %v1073_v35  ;;  %v1074_v58 = vsub.f32 %v1556_v56, %v1073_v35 }
 0x18a   : > { %1263 = vmatmul.f32.gmra.mxu2 %v1074_v58  ;;  %v1075_v1 = vand.u32 4294901760, %v1074_v58 }
 0x18c   : > { %1319 = vmatmul.f32.gmra.mxu3 %v1075_v1  ;;  %v1076_v4 = vsub.f32 %v1074_v58, %v1075_v1 }
 0x18d   : > { %v1558_v29 = vpop.eup %1557 }
 0x18e   : > { %v1077_v30 = vand.u32 4294901760, %v1076_v4  ;;  %v1081_v39 = vand.u32 4294901760, %v1558_v29 }
 0x190   : > { %1078 = vmatmul.f32.gmra.mxu0 %v1077_v30  ;;  %1199 = vmatmul.f32.gmra.mxu1 %v1081_v39  ;;  %v1082_v49 = vsub.f32 %v1558_v29, %v1081_v39 }
 0x192   : > { %1268 = vmatmul.f32.gmra.mxu2 %v1082_v49  ;;  %v1083_v45 = vand.u32 4294901760, %v1082_v49 }
 0x194   : > { %1325 = vmatmul.f32.gmra.mxu3 %v1083_v45  ;;  %v1084_v51 = vsub.f32 %v1082_v49, %v1083_v45 }
 0x196   : > { %v1085_v52 = vand.u32 4294901760, %v1084_v51 }
 0x198   : > { %1086 = vmatmul.f32.gmra.mxu0 %v1085_v52  ;;  %1443 = vmatmul.f32.vlgmr.msra.gmra.mxu1 %v1057_v48 }
 0x1a0   : > { %1394 = vmatmul.f32.vlgmr.msra.gmra.mxu0 %v1057_v48  ;;  %1447 = vmatmul.f32.gmra.mxu1 %v1065_v7 }
 0x1a8   : > { %1398 = vmatmul.f32.gmra.mxu0 %v1065_v7  ;;  %1451 = vmatmul.f32.gmra.mxu1 %v1073_v35 }
 0x1b0   : > { %1402 = vmatmul.f32.gmra.mxu0 %v1073_v35  ;;  %1455 = vmatmul.f32.gmra.mxu1 %v1081_v39 }
 0x1b8   : > { %1406 = vmatmul.f32.gmra.mxu0 %v1081_v39 }
 0x1f5   : > { %v1188_v59 = vpop.f32.mrf.mxu1 }
 0x1fd   : > { %v1063_v38 = vpop.f32.mrf.mxu0  ;;  %v1192_v46 = vpop.f32.mrf.mxu1 }
 0x1fe   : > { %v1064_v11 = vadd.f32 %v1542_v6, %v1063_v38  ;;  %v1254_v19 = vpop.f32.mrf.mxu2 }
 0x1ff   : > { %v1308_v24 = vpop.f32.mrf.mxu3 }
 0x200   : > { %v1189_v23 = vadd.f32 %v1188_v59, %v1064_v11 }
 0x202   : > { %v1255_v34 = vadd.f32 %v1254_v19, %v1189_v23 }
 0x204   : > { %v1309_v62 = vadd.f32 %v1308_v24, %v1255_v34 }
 0x205   : > { %v1071_v63 = vpop.f32.mrf.mxu0  ;;  %v1196_v53 = vpop.f32.mrf.mxu1 }
 0x206   : > { %v1072_v36 = vadd.f32 %v1542_v6, %v1071_v63  ;;  %v1259_v54 = vpop.f32.mrf.mxu2 }
 0x207   : > { %v1314_v21 = vpop.f32.mrf.mxu3 }
 0x208   : > { %v1193_v8 = vadd.f32 %v1192_v46, %v1072_v36 }
 0x20a   : > { %v1260_v22 = vadd.f32 %v1259_v54, %v1193_v8 }
 0x20c   : > { %v1315_v44 = vadd.f32 %v1314_v21, %v1260_v22 }
 0x20d   : > { %v1079_v0 = vpop.f32.mrf.mxu0  ;;  %v1200_v10 = vpop.f32.mrf.mxu1 }
 0x20e   : > { %v1080_v26 = vadd.f32 %v1542_v6, %v1079_v0  ;;  %v1264_v61 = vpop.f32.mrf.mxu2 }
 0x20f   : > { %v1320_v5 = vpop.f32.mrf.mxu3 }
 0x210   : > { %v1197_v48 = vadd.f32 %v1196_v53, %v1080_v26 }
 0x212   : > { %v1265_v42 = vadd.f32 %v1264_v61, %v1197_v48 }
 0x214   : > { %v1321_v12 = vadd.f32 %v1320_v5, %v1265_v42 }
 0x215   : > { %v1087_v31 = vpop.f32.mrf.mxu0  ;;  %v1444_v50 = vpop.f32.mrf.mxu1 }
 0x216   : > { %v1088_v47 = vadd.f32 %v1542_v6, %v1087_v31  ;;  %v1269_v3 = vpop.f32.mrf.mxu2 }
 0x217   : > { %v1326_v15 = vpop.f32.mrf.mxu3 }
 0x218   : > { %v1201_v17 = vadd.f32 %v1200_v10, %v1088_v47 }
 0x21a   : > { %v1270_v7 = vadd.f32 %v1269_v3, %v1201_v17 }
 0x21c   : > { %v1327_v16 = vadd.f32 %v1326_v15, %v1270_v7 }
 0x21d   : > { %v1395_v9 = vpop.f32.mrf.mxu0  ;;  %v1448_v43 = vpop.f32.mrf.mxu1 }
 0x21e   : > { %v1396_v13 = vadd.f32 %v1395_v9, %v1309_v62 }
 0x220   : > { %v1445_v27 = vadd.f32 %v1444_v50, %v1396_v13 }
 0x222   : > { %1459 = vst.msk [vmem:[%s2232_s22] sm:$0xff] %vm291_vm0, %v1445_v27 }
 0x225   : > { %v1399_v37 = vpop.f32.mrf.mxu0  ;;  %v1452_v18 = vpop.f32.mrf.mxu1 }
 0x226   : > { %v1400_v40 = vadd.f32 %v1399_v37, %v1315_v44 }
 0x228   : > { %v1449_v57 = vadd.f32 %v1448_v43, %v1400_v40 }
 0x22a   : > { %1460 = vst.msk [vmem:[%s2232_s22 + $0x8] sm:$0xff] %vm291_vm0, %v1449_v57 }
 0x22d   : > { %v1403_v25 = vpop.f32.mrf.mxu0  ;;  %v1456_v32 = vpop.f32.mrf.mxu1 }
 0x22e   : > { %v1404_v2 = vadd.f32 %v1403_v25, %v1321_v12 }
 0x230   : > { %v1453_v14 = vadd.f32 %v1452_v18, %v1404_v2 }
 0x232   : > { %1461 = vst.msk [vmem:[%s2232_s22 + $0x10] sm:$0xff] %vm291_vm0, %v1453_v14 }
 0x235   : > { %v1407_v20 = vpop.f32.mrf.mxu0 }
 0x236   : > { %v1408_v28 = vadd.f32 %v1407_v20, %v1327_v16 }
 0x238   : > { %v1457_v33 = vadd.f32 %v1456_v32, %v1408_v28 }
 0x23a   : > { %1462 = vst.msk [vmem:[%s2232_s22 + $0x18] sm:$0xff] %vm291_vm0, %v1457_v33 }
 0x23b PF: > { %s17_s24 = sadd.s32 1, %s1565_s24  }
 0x23c   : > { %p14_p4 = scmp.ge.s32.totalorder %s17_s24, 4  }
 0x23e   :  { %16 = sbr.rel (!%p14_p4) target bundleno = 1 (0x1), region = 78 }

</bundles_post_ra>
